<compile_context>
chip_gen: v6e
topology: v6e:2x2x1
jax: 0.10.0
libtpu: 0.0.40
codegen_flags: <defaults>
</compile_context>

<pallas_src>
import functools

import jax
import jax.numpy as jnp
from jax import lax
from jax.experimental import pallas as pl
from jax.experimental.pallas import tpu as pltpu

_I32_MAX = 2147483647          # Python int -> jaxpr literal (no captured const)


def _batch_tile(B):
    # Second-to-last block dim must be a multiple of 8 or the full dim.
    return 8 if (B % 8 == 0) else B


def _vocab_tile(V, tv):
    # Last block dim must be a multiple of 128 or the full dim.
    if tv >= V:
        return V
    return max(128, (tv // 128) * 128)


def _fmix32(x):
    # murmur3/splitmix-style 32-bit avalanche finalizer (uint32, pure jnp ops:
    # works under Mosaic and interpret mode; no TPU-only PRNG primitives).
    x = x ^ (x >> 16)
    x = x * jnp.uint32(0x7FEB352D)
    x = x ^ (x >> 15)
    x = x * jnp.uint32(0x846CA68B)
    x = x ^ (x >> 16)
    return x


# ----------------------------------------------------------------------------
# Greedy kernel: tiled argmax over the vocab (lane) axis.
# ----------------------------------------------------------------------------
def _argmax_kernel(x_ref, ids_ref, max_sc, arg_sc, *, vocab):
    j = pl.program_id(1)
    tb, tv = x_ref.shape

    @pl.when(j == 0)
    def _():
        max_sc[...] = jnp.full_like(max_sc, -jnp.inf)
        arg_sc[...] = jnp.zeros_like(arg_sc)

    col = lax.broadcasted_iota(jnp.int32, (tb, tv), 1) + j * tv
    # Mask the tail of the last (partial) vocab tile.
    x = jnp.where(col < vocab, x_ref[...], -jnp.inf)

    blk_max = jnp.max(x, axis=-1, keepdims=True)
    blk_arg = jnp.min(jnp.where(x == blk_max, col, _I32_MAX),
                      axis=-1, keepdims=True)

    better = blk_max > max_sc[...]          # strict > keeps first occurrence
    arg_sc[...] = jnp.where(better, blk_arg, arg_sc[...])
    max_sc[...] = jnp.where(better, blk_max, max_sc[...])

    @pl.when(j == pl.num_programs(1) - 1)
    def _():
        ids_ref[...] = arg_sc[...]


def greedy_argmax(logits, *, tv=8192):
    B, V = logits.shape
    tb = _batch_tile(B)
    tv = _vocab_tile(V, tv)
    grid = (B // tb, pl.cdiv(V, tv))
    kernel = functools.partial(_argmax_kernel, vocab=V)
    ids = pl.pallas_call(
        kernel,
        out_shape=jax.ShapeDtypeStruct((B, 1), jnp.int32),
        grid_spec=pltpu.PrefetchScalarGridSpec(
            num_scalar_prefetch=0,
            grid=grid,
            in_specs=[pl.BlockSpec((tb, tv), lambda i, j: (i, j))],
            out_specs=pl.BlockSpec((tb, 1), lambda i, j: (i, 0)),
            scratch_shapes=[pltpu.VMEM((tb, 1), jnp.float32),
                            pltpu.VMEM((tb, 1), jnp.int32)]),
        compiler_params=pltpu.CompilerParams(
            dimension_semantics=("parallel", "arbitrary")),
    )(logits)
    return ids[:, 0]


# ----------------------------------------------------------------------------
# Non-greedy kernel: temperature scaling + Gumbel-max sampling, with
# temperature==0 rows falling back to argmax of the original logits.
# ----------------------------------------------------------------------------
def _sample_kernel(seed_ref, temp_ref, x_ref, ids_ref, probs_ref,
                   gmax_sc, garg_sc, amax_sc, aarg_sc, *, vocab, vocab_pad):
    i = pl.program_id(0)
    j = pl.program_id(1)
    tb, tv = x_ref.shape

    @pl.when(j == 0)
    def _():
        gmax_sc[...] = jnp.full_like(gmax_sc, -jnp.inf)
        garg_sc[...] = jnp.zeros_like(garg_sc)
        amax_sc[...] = jnp.full_like(amax_sc, -jnp.inf)
        aarg_sc[...] = jnp.zeros_like(aarg_sc)

    x = x_ref[...]
    temp = temp_ref[...]

    # Per-row reciprocals (cheap, (tb,1)): keeps the single EUP slot free for
    # the two per-element logs of the Gumbel noise.
    inv_temp = 1.0 / temp                         # +inf when temp == 0
    safe_t = jnp.where(temp == 0.0, 1.0, temp)
    inv_safe_t = 1.0 / safe_t

    # probs output == logits / temperatures (reciprocal-multiply; differs from
    # a literal divide by <=~1 ulp, identical +/-inf behaviour for temp==0).
    probs_ref[...] = x * inv_temp

    # --- counter-based uniform noise (no TPU stateful PRNG primitives) ------
    row_g = lax.broadcasted_iota(jnp.int32, (tb, tv), 0) + i * tb
    col = lax.broadcasted_iota(jnp.int32, (tb, tv), 1) + j * tv
    ctr = (row_g * vocab_pad + col).astype(jnp.uint32)   # distinct per element
    seed_mix = (seed_ref[0].astype(jnp.uint32) * jnp.uint32(0x9E3779B9)
                + jnp.uint32(0x85EBCA6B))
    bits = _fmix32(ctr ^ seed_mix)
    # top 23 bits -> u strictly inside (0,1): Gumbel transform needs no guards
    u = ((bits >> 9).astype(jnp.float32) + 0.5) * jnp.float32(1.0 / (1 << 23))
    gumbel = -jnp.log(-jnp.log(u))

    valid = col < vocab

    # running Gumbel-max (categorical sample over softmax(logits/temp))
    pert = jnp.where(valid, x * inv_safe_t + gumbel, -jnp.inf)
    gm = jnp.max(pert, axis=-1, keepdims=True)
    ga = jnp.min(jnp.where(pert == gm, col, _I32_MAX), axis=-1, keepdims=True)
    gb = gm > gmax_sc[...]
    garg_sc[...] = jnp.where(gb, ga, garg_sc[...])
    gmax_sc[...] = jnp.where(gb, gm, gmax_sc[...])

    # running plain argmax on the ORIGINAL logits (temperature==0 fallback)
    xm = jnp.where(valid, x, -jnp.inf)
    am = jnp.max(xm, axis=-1, keepdims=True)
    aa = jnp.min(jnp.where(xm == am, col, _I32_MAX), axis=-1, keepdims=True)
    ab = am > amax_sc[...]
    aarg_sc[...] = jnp.where(ab, aa, aarg_sc[...])
    amax_sc[...] = jnp.where(ab, am, amax_sc[...])

    @pl.when(j == pl.num_programs(1) - 1)
    def _():
        ids_ref[...] = jnp.where(temp == 0.0, aarg_sc[...], garg_sc[...])


def sample_from_logits(logits, temperatures, seed, *, tv=8192):
    B, V = logits.shape
    tb = _batch_tile(B)
    tv = _vocab_tile(V, tv)
    grid = (B // tb, pl.cdiv(V, tv))
    seed_arr = jnp.asarray([seed], dtype=jnp.int32)
    kernel = functools.partial(_sample_kernel, vocab=V, vocab_pad=grid[1] * tv)
    ids, probs = pl.pallas_call(
        kernel,
        out_shape=(jax.ShapeDtypeStruct((B, 1), jnp.int32),
                   jax.ShapeDtypeStruct((B, V), jnp.float32)),
        grid_spec=pltpu.PrefetchScalarGridSpec(
            num_scalar_prefetch=1,
            grid=grid,
            in_specs=[pl.BlockSpec((tb, 1), lambda i, j, s: (i, 0)),
                      pl.BlockSpec((tb, tv), lambda i, j, s: (i, j))],
            out_specs=[pl.BlockSpec((tb, 1), lambda i, j, s: (i, 0)),
                       pl.BlockSpec((tb, tv), lambda i, j, s: (i, j))],
            scratch_shapes=[pltpu.VMEM((tb, 1), jnp.float32),
                            pltpu.VMEM((tb, 1), jnp.int32),
                            pltpu.VMEM((tb, 1), jnp.float32),
                            pltpu.VMEM((tb, 1), jnp.int32)]),
        compiler_params=pltpu.CompilerParams(
            dimension_semantics=("parallel", "arbitrary")),
    )(seed_arr, temperatures, logits)
    return ids[:, 0], probs


# ----------------------------------------------------------------------------
# SamplingOptions / Sampler mirrors of the PyTorch module (no learned params).
# ----------------------------------------------------------------------------
class SamplingOptions:
    def __init__(self, bsz=1, temperatures=None, top_ps=None):
        if temperatures is None and top_ps is None:
            self.temperatures = jnp.zeros((bsz, 1), jnp.float32)
            self.top_ps = jnp.ones((bsz, 1), jnp.float32)
            self.top_ks = jnp.ones((bsz, 1), jnp.float32)
            self.need_min_p_sampling = False
            self.is_all_greedy = True
        else:
            self.temperatures = (temperatures[:, None] if temperatures is not None
                                 else jnp.ones((bsz, 1), jnp.float32))
            self.top_ps = (top_ps[:, None] if top_ps is not None
                           else jnp.ones((bsz, 1), jnp.float32))
            self.top_ks = jnp.ones((bsz, 1), jnp.float32)
            self.need_min_p_sampling = False
            self.is_all_greedy = False


class Sampler:
    def __call__(self, logits, sampling_config=None, seed=0):
        if sampling_config is None:
            sampling_config = SamplingOptions(bsz=logits.shape[0])
        logits = jnp.asarray(logits, jnp.float32)
        if sampling_config.is_all_greedy:
            probs = logits
            ids = greedy_argmax(logits)
        else:
            ids, probs = sample_from_logits(
                logits, sampling_config.temperatures, seed)
        return ids.astype(jnp.int32), probs


# ----------------------------------------------------------------------------
if __name__ == "__main__":
    key = jax.random.PRNGKey(0)
    bsz, vocab = 4, 1024
    k1, k2 = jax.random.split(key)
    logits = jax.random.normal(k1, (bsz, vocab), dtype=jnp.float32)

    sampler = Sampler()

    # --- Default path (sampling_config=None): greedy argmax ------------------
    ids_greedy, probs_greedy = sampler(logits)
    jax.block_until_ready((ids_greedy, probs_greedy))
    ref_ids = jnp.argmax(logits, axis=-1).astype(jnp.int32)
    assert ids_greedy.shape == (bsz,)
    assert ids_greedy.dtype == jnp.int32
    assert bool(jnp.all(ids_greedy == ref_ids))
    assert bool(jnp.all(probs_greedy == logits))

    # --- Greedy with non-divisible vocab (multi-tile + tail masking) ---------
    v2 = 1000
    logits2 = jax.random.normal(k2, (bsz, v2), dtype=jnp.float32)
    ids2 = greedy_argmax(logits2, tv=256)
    jax.block_until_ready(ids2)
    assert bool(jnp.all(ids2 == jnp.argmax(logits2, axis=-1).astype(jnp.int32)))

    # --- Non-greedy path with mixed temperatures ------------------------------
    spike_row, spike_col = 2, 7
    logits_s = logits.at[spike_row, spike_col].set(50.0)   # overwhelming peak
    temps = jnp.array([1.0, 0.0, 0.5, 2.0], dtype=jnp.float32)
    cfg = SamplingOptions(bsz=bsz, temperatures=temps,
                          top_ps=jnp.ones((bsz,), jnp.float32))
    ids_samp, probs_samp = sampler(logits_s, cfg, seed=123)
    jax.block_until_ready((ids_samp, probs_samp))
    assert ids_samp.shape == (bsz,)
    assert ids_samp.dtype == jnp.int32
    assert bool(jnp.all((ids_samp >= 0) & (ids_samp < vocab)))
    # temp==0 row falls back to argmax of the original logits
    assert int(ids_samp[1]) == int(jnp.argmax(logits_s[1]))
    # the +50 spike (temp=0.5) dominates any Gumbel noise -> must be picked
    assert int(ids_samp[spike_row]) == spike_col
    # probs == logits / temperatures for temp > 0 rows (reciprocal-multiply)
    ref_probs = logits_s / temps[:, None]
    ok = jnp.isclose(probs_samp, ref_probs, rtol=1e-5, atol=1e-6)
    assert bool(jnp.all(jnp.where((temps > 0)[:, None], ok, True)))

    # --- Non-greedy with non-divisible vocab (tail masking in sampler) -------
    temps3 = jnp.array([0.7, 0.0, 0.5, 1.3], dtype=jnp.float32)
    logits3 = logits2.at[2, 900].set(60.0)
    ids3, probs3 = sample_from_logits(logits3, temps3[:, None], seed=7, tv=256)
    jax.block_until_ready((ids3, probs3))
    assert probs3.shape == (bsz, v2)
    assert bool(jnp.all((ids3 >= 0) & (ids3 < v2)))
    assert int(ids3[1]) == int(jnp.argmax(logits3[1]))
    assert int(ids3[2]) == 900

    print("KERNEL_OK")
</pallas_src>

<mosaic_0001>
module attributes {stable_mosaic.version = 11 : i64} {
  func.func @_argmax_kernel(%arg0: i32, %arg1: i32, %arg2: memref<4x1024xf32, #tpu.memory_space<vmem>>, %arg3: memref<4x1xi32, #tpu.memory_space<vmem>>, %arg4: memref<4x1xf32, #tpu.memory_space<vmem>>, %arg5: memref<4x1xi32, #tpu.memory_space<vmem>>) attributes {dimension_semantics = [#tpu.dimension_semantics<parallel>, #tpu.dimension_semantics<arbitrary>], iteration_bounds = array<i64: 1, 1>, scalar_prefetch = 0 : i64, scratch_operands = 2 : i64, tpu.core_type = #tpu.core_type<tc>, window_params = [{transform_indices = @transform_0, window_bounds = array<i64: 4, 1024>}, {transform_indices = @transform_1, window_bounds = array<i64: 4, 1>}]} {
    %c0_i32 = arith.constant 0 : i32
    %0 = arith.cmpi eq, %arg1, %c0_i32 : i32
    %1 = arith.extui %0 : i1 to i32
    %c0_i32_0 = arith.constant 0 : i32
    %2 = arith.cmpi ne, %1, %c0_i32_0 : i32
    scf.if %2 {
      %cst_17 = arith.constant 0xFF800000 : f32
      %31 = vector.broadcast %cst_17 : f32 to vector<4x1xf32>
      %c0_18 = arith.constant 0 : index
      %c0_19 = arith.constant 0 : index
      %32 = vector.load %arg4[%c0_18, %c0_19] : memref<4x1xf32, #tpu.memory_space<vmem>>, vector<4x1xf32>
      tpu.vector_store %arg4[%c0_18, %c0_19], %31 {strides = array<i32>} : memref<4x1xf32, #tpu.memory_space<vmem>>, vector<4x1xf32>,
      %c0_i32_20 = arith.constant 0 : i32
      %33 = vector.broadcast %c0_i32_20 : i32 to vector<4x1xi32>
      %c0_21 = arith.constant 0 : index
      %c0_22 = arith.constant 0 : index
      %34 = vector.load %arg5[%c0_21, %c0_22] : memref<4x1xi32, #tpu.memory_space<vmem>>, vector<4x1xi32>
      tpu.vector_store %arg5[%c0_21, %c0_22], %33 {strides = array<i32>} : memref<4x1xi32, #tpu.memory_space<vmem>>, vector<4x1xi32>,
    } else {
    }
    %3 = tpu.iota {dimensions = array<i32: 1>} : vector<4x1024xi32>
    %c1024_i32 = arith.constant 1024 : i32
    %4 = arith.muli %arg1, %c1024_i32 : i32
    %5 = vector.broadcast %4 : i32 to vector<4x1024xi32>
    %6 = arith.addi %3, %5 : vector<4x1024xi32>
    %c1024_i32_1 = arith.constant 1024 : i32
    %7 = vector.broadcast %c1024_i32_1 : i32 to vector<4x1024xi32>
    %8 = arith.cmpi slt, %6, %7 : vector<4x1024xi32>
    %c0 = arith.constant 0 : index
    %c0_2 = arith.constant 0 : index
    %9 = vector.load %arg2[%c0, %c0_2] : memref<4x1024xf32, #tpu.memory_space<vmem>>, vector<4x1024xf32>
    %cst = arith.constant 0xFF800000 : f32
    %10 = vector.broadcast %cst : f32 to vector<4x1024xf32>
    %11 = arith.select %8, %9, %10 : vector<4x1024xi1>, vector<4x1024xf32>
    %cst_3 = arith.constant dense<0xFF800000> : vector<4xf32>
    %12 = vector.multi_reduction <maximumf>, %11, %cst_3 [1] : vector<4x1024xf32> to vector<4xf32>
    %13 = vector.shape_cast %12 : vector<4xf32> to vector<4x1xf32>
    %14 = vector.broadcast %13 : vector<4x1xf32> to vector<4x1024xf32>
    %15 = arith.cmpf oeq, %11, %14 : vector<4x1024xf32>
    %c2147483647_i32 = arith.constant 2147483647 : i32
    %16 = vector.broadcast %c2147483647_i32 : i32 to vector<4x1024xi32>
    %17 = arith.select %15, %6, %16 : vector<4x1024xi1>, vector<4x1024xi32>
    %cst_4 = arith.constant dense<2147483647> : vector<4xi32>
    %18 = vector.multi_reduction <minsi>, %17, %cst_4 [1] : vector<4x1024xi32> to vector<4xi32>
    %19 = vector.shape_cast %18 : vector<4xi32> to vector<4x1xi32>
    %c0_5 = arith.constant 0 : index
    %c0_6 = arith.constant 0 : index
    %20 = vector.load %arg4[%c0_5, %c0_6] : memref<4x1xf32, #tpu.memory_space<vmem>>, vector<4x1xf32>
    %21 = arith.cmpf ogt, %13, %20 : vector<4x1xf32>
    %c0_7 = arith.constant 0 : index
    %c0_8 = arith.constant 0 : index
    %22 = vector.load %arg5[%c0_7, %c0_8] : memref<4x1xi32, #tpu.memory_space<vmem>>, vector<4x1xi32>
    %23 = arith.select %21, %19, %22 : vector<4x1xi1>, vector<4x1xi32>
    %c0_9 = arith.constant 0 : index
    %c0_10 = arith.constant 0 : index
    %24 = vector.load %arg5[%c0_9, %c0_10] : memref<4x1xi32, #tpu.memory_space<vmem>>, vector<4x1xi32>
    tpu.vector_store %arg5[%c0_9, %c0_10], %23 {strides = array<i32>} : memref<4x1xi32, #tpu.memory_space<vmem>>, vector<4x1xi32>,
    %c0_11 = arith.constant 0 : index
    %c0_12 = arith.constant 0 : index
    %25 = vector.load %arg4[%c0_11, %c0_12] : memref<4x1xf32, #tpu.memory_space<vmem>>, vector<4x1xf32>
    %26 = arith.select %21, %13, %25 : vector<4x1xi1>, vector<4x1xf32>
    %c0_13 = arith.constant 0 : index
    %c0_14 = arith.constant 0 : index
    %27 = vector.load %arg4[%c0_13, %c0_14] : memref<4x1xf32, #tpu.memory_space<vmem>>, vector<4x1xf32>
    tpu.vector_store %arg4[%c0_13, %c0_14], %26 {strides = array<i32>} : memref<4x1xf32, #tpu.memory_space<vmem>>, vector<4x1xf32>,
    %c0_i32_15 = arith.constant 0 : i32
    %28 = arith.cmpi eq, %arg1, %c0_i32_15 : i32
    %29 = arith.extui %28 : i1 to i32
    %c0_i32_16 = arith.constant 0 : i32
    %30 = arith.cmpi ne, %29, %c0_i32_16 : i32
    scf.if %30 {
      %c0_17 = arith.constant 0 : index
      %c0_18 = arith.constant 0 : index
      %31 = vector.load %arg5[%c0_17, %c0_18] : memref<4x1xi32, #tpu.memory_space<vmem>>, vector<4x1xi32>
      %c0_19 = arith.constant 0 : index
      %c0_20 = arith.constant 0 : index
      %32 = vector.load %arg3[%c0_19, %c0_20] : memref<4x1xi32, #tpu.memory_space<vmem>>, vector<4x1xi32>
      tpu.vector_store %arg3[%c0_19, %c0_20], %31 {strides = array<i32>} : memref<4x1xi32, #tpu.memory_space<vmem>>, vector<4x1xi32>,
    } else {
    }
    return
  }
  func.func @transform_0(%arg0: i32, %arg1: i32) -> (i32, i32) {
    %c0_i32 = arith.constant 0 : i32
    return %arg0, %arg1 : i32, i32
  }
  func.func @transform_1(%arg0: i32, %arg1: i32) -> (i32, i32) {
    %c0_i32 = arith.constant 0 : i32
    %c0_i32_0 = arith.constant 0 : i32
    return %arg0, %c0_i32 : i32, i32
  }
}

</mosaic_0001>

<bundles_post_ra>
// kernel: tpu_custom_call.1
= control target key start
LH: loop header
LB: loop body
LE: loop exit
PB: predicated region body
PF: predicated region fallthrough
CT: control target
= control target key end

     0   :  { %6 = vsyncpa [#allocation5], 0  ;;  %s196_s6 = smov [#allocation4]   ;;  %s252_s0 = inlined_call_operand.hbm [shape: f32[4,1024], index: 0, kind: input, shape index: {}]   ;;  %s253_s1 = inlined_call_operand.vmem [shape: s32[4,1], index: 1, kind: output, shape index: {}]  }
   0x1   :  { %s13_s7 = sshll.u32 %s196_s6, 4  ;;  %s14_s7 = int_to_ptr.vmem [resolvable:$true] %s13_s7 }
   0x2   :  { %s182_s8 = scalar_lea.vmem %s14_s7, 512  ;;  %p187_p1 = scmp.lt.s32.totalorder %s14_s7, %s14_s7 }
   0x3   :  { %p183_p0 = scmp.ne.s32.totalorder %s14_s7, %s182_s8  ;;  %p188_p2 = scmp.lt.s32.totalorder %s182_s8, %s182_s8 }
   0x5   :  { %p189_p3 = por %p188_p2, %p187_p1 }
   0x7   :  { %p190_p4 = pnand %p189_p3, %p183_p0 }
   0x9   :  { %193 = shalt.err (!%p190_p4)
}
   0xa   :  { %16 = dma.hbm_to_vmem [thread:$0]  %s252_s0, 512, %s14_s7, [#allocation5]  }
   0xb   :  { %194 = dma.done.wait [#allocation5], 512  }
   0xc   :  { %195 = vsyncadd [#allocation5], 4294966784  ;;  %vm78_vm0 = vcmask 1043456   ;;  %v54_v0 = vld [vmem:[#allocation4] sm:$0xff]  ;;  %v55_v1 = vld [vmem:[#allocation4 + $0x8] sm:$0xff]  ;;  %vm24_vm1 = vcmask 3072   ;;  %v27_v24 = vlaneseq }
   0xd   :  { %v56_v2 = vld [vmem:[#allocation4 + $0x10] sm:$0xff]  ;;  %v57_v3 = vld [vmem:[#allocation4 + $0x18] sm:$0xff]  ;;  %v62_v4 = vcombine.high %v54_v0, %v54_v0  ;;  %v63_v5 = vcombine.high %v55_v1, %v55_v1  ;;  %v79_v7 = vsel %vm78_vm0, %v54_v0, -inf  ;;  %v81_v9 = vsel %vm78_vm0, %v55_v1, -inf }
   0xe   :  { %v64_v6 = vcombine.high %v56_v2, %v56_v2  ;;  %v65_v8 = vcombine.high %v57_v3, %v57_v3  ;;  %v83_v10 = vsel %vm78_vm0, %v56_v2, -inf  ;;  %v87_v11 = vsel %vm78_vm0, %v57_v3, -inf }
   0xf   :  { %v80_v12 = vsel %vm78_vm0, %v62_v4, -inf  ;;  %v82_v13 = vsel %vm78_vm0, %v63_v5, -inf  ;;  %v84_v14 = vmax.f32 %v79_v7, %v83_v10  ;;  %v88_v17 = vmax.f32 %v81_v9, %v87_v11 }
  0x10   :  { %v85_v15 = vsel %vm78_vm0, %v64_v6, -inf  ;;  %v89_v18 = vsel %vm78_vm0, %v65_v8, -inf  ;;  %v197_v23 = vmov -inf   ;;  %v28_v25 = vand.u32 127, %v27_v24 }
  0x11   :  { %v86_v16 = vmax.f32 %v80_v12, %v85_v15  ;;  %v90_v19 = vmax.f32 %v82_v13, %v89_v18  ;;  %25 = vst.msk [vmem:[#allocation2] sm:$0xf] %vm24_vm1, %v197_v23  ;;  %v198_v62 = vmov 0  }
  0x12   :  { %v29_v26 = vadd.s32 128, %v28_v25  ;;  %v30_v27 = vadd.s32 256, %v28_v25  ;;  %v31_v28 = vadd.s32 384, %v28_v25  ;;  %v32_v30 = vadd.s32 512, %v28_v25  ;;  %26 = vst.msk [vmem:[#allocation3] sm:$0xf] %vm24_vm1, %v198_v62 }
  0x13   :  { %v91_v20 = vmax.f32 %v84_v14, %v86_v16  ;;  %v92_v21 = vmax.f32 %v88_v17, %v90_v19  ;;  %v33_v31 = vadd.s32 640, %v28_v25  ;;  %v34_v32 = vadd.s32 768, %v28_v25 }
  0x14   :  { %v35_v33 = vadd.s32 896, %v28_v25 }
  0x15   :  { %v93_v22 = vmax.f32 %v91_v20, %v92_v21 }
  0x17   :  { %94 = vmax.xlane.f32.xlu0 %v93_v22 }
  0x18   :  { %v148_v34 = vld [vmem:[#allocation2] sm:$0xf] }
  0x19   :  { %v154_v35 = vld [vmem:[#allocation2] sm:$0xf]  ;;  %v150_v7 = vld [vmem:[#allocation3] sm:$0xf] }
  0xa0   :  { %v221_v29 = vpop.xlane.xlu0 %94 }
  0xa1   :  { %vm96_vm2 = vcmp.eq.f32.partialorder %v54_v0, %v221_v29  ;;  %vm97_vm3 = vcmp.eq.f32.partialorder %v62_v4, %v221_v29  ;;  %vm98_vm4 = vcmp.eq.f32.partialorder %v55_v1, %v221_v29  ;;  %vm99_vm5 = vcmp.eq.f32.partialorder %v63_v5, %v221_v29 }
  0xa2   :  { %vm100_vm6 = vcmp.eq.f32.partialorder %v56_v2, %v221_v29  ;;  %vm101_vm7 = vcmp.eq.f32.partialorder %v64_v6, %v221_v29  ;;  %vm102_vm8 = vcmp.eq.f32.partialorder %v57_v3, %v221_v29  ;;  %vm103_vm9 = vcmp.eq.f32.partialorder %v65_v8, %v221_v29 }
  0xa3   :  { %v104_v36 = vsel %vm96_vm2, %v28_v25, 2147483647  ;;  %v105_v37 = vsel %vm97_vm3, %v29_v26, 2147483647  ;;  %v106_v38 = vsel %vm98_vm4, %v30_v27, 2147483647  ;;  %vm149_vm10 = vcmp.gt.f32.partialorder %v221_v29, %v148_v34 }
  0xa4   :  { %v107_v39 = vsel %vm99_vm5, %v31_v28, 2147483647  ;;  %v108_v40 = vsel %vm100_vm6, %v32_v30, 2147483647  ;;  %v109_v41 = vsel %vm101_vm7, %v33_v31, 2147483647  ;;  %v155_v42 = vsel %vm149_vm10, %v221_v29, %v154_v35 }
  0xa5   :  { %v110_v43 = vsel %vm102_vm8, %v34_v32, 2147483647  ;;  %v111_v44 = vsel %vm103_vm9, %v35_v33, 2147483647  ;;  %v112_v45 = vsel %vm78_vm0, %v104_v36, 2147483647 }
  0xa6   :  { %156 = vst.msk [vmem:[#allocation2] sm:$0xf] %vm24_vm1, %v155_v42  ;;  %v113_v46 = vsel %vm78_vm0, %v105_v37, 2147483647  ;;  %v114_v47 = vsel %vm78_vm0, %v106_v38, 2147483647 }
  0xa7   :  { %v115_v48 = vsel %vm78_vm0, %v107_v39, 2147483647  ;;  %v116_v49 = vsel %vm78_vm0, %v108_v40, 2147483647  ;;  %v119_v50 = vsel %vm78_vm0, %v109_v41, 2147483647 }
  0xa8   :  { %v122_v51 = vsel %vm78_vm0, %v110_v43, 2147483647  ;;  %vm117_vm11 = vcmp.lt.s32.totalorder %v112_v45, %v116_v49  ;;  %vm120_vm12 = vcmp.lt.s32.totalorder %v113_v46, %v119_v50  ;;  %v125_v52 = vsel %vm78_vm0, %v111_v44, 2147483647 }
  0xa9   :  { %vm123_vm13 = vcmp.lt.s32.totalorder %v114_v47, %v122_v51  ;;  %v118_v53 = vsel %vm117_vm11, %v112_v45, %v116_v49  ;;  %v121_v54 = vsel %vm120_vm12, %v113_v46, %v119_v50  ;;  %vm126_vm14 = vcmp.lt.s32.totalorder %v115_v48, %v125_v52 }
  0xaa   :  { %v124_v55 = vsel %vm123_vm13, %v114_v47, %v122_v51  ;;  %v127_v56 = vsel %vm126_vm14, %v115_v48, %v125_v52  ;;  %vm128_vm15 = vcmp.lt.s32.totalorder %v118_v53, %v121_v54 }
  0xab   :  { %v129_v57 = vsel %vm128_vm15, %v118_v53, %v121_v54  ;;  %vm130_vm2 = vcmp.lt.s32.totalorder %v124_v55, %v127_v56 }
  0xac   :  { %v131_v58 = vsel %vm130_vm2, %v124_v55, %v127_v56 }
  0xad   :  { %vm132_vm3 = vcmp.lt.s32.totalorder %v129_v57, %v131_v58 }
  0xae   :  { %v133_v59 = vsel %vm132_vm3, %v129_v57, %v131_v58 }
  0xaf   :  { %v135_v60 = vshra.s32 %v133_v59, 16  ;;  %v134_v63 = vand.u32 65535, %v133_v59 }
  0xb1   :  { %v137_v61 = vcvt.s32.f32 %v135_v60  ;;  %v136_v1 = vcvt.s32.f32 %v134_v63 }
  0xb3   :  { %138 = vmin.xlane.f32.xlu0 %v137_v61 }
 0x13c   :  { %v139_v0 = vpop.xlane.xlu0 %138 }
 0x13d   :  { %vm140_vm0 = vcmp.eq.f32.partialorder %v137_v61, %v139_v0  ;;  %v145_v3 = vcvt.f32.s32 %v139_v0 }
 0x13e   :  { %v141_v2 = vsel %vm140_vm0, %v136_v1, inf }
 0x13f   :  { %142 = vmin.xlane.f32.xlu1 %v141_v2  ;;  %v146_v5 = vshll.u32 %v145_v3, 16 }
 0x1c8   :  { %v143_v4 = vpop.xlane.xlu1 %142 }
 0x1c9   :  { %v144_v6 = vcvt.f32.s32 %v143_v4 }
 0x1cb   :  { %v147_v8 = vadd.s32 %v146_v5, %v144_v6 }
 0x1cd   :  { %v151_v9 = vsel %vm149_vm10, %v147_v8, %v150_v7 }
 0x1ce   :  { %153 = vst.msk [vmem:[#allocation3] sm:$0xf] %vm24_vm1, %v151_v9 }
 0x1d5   :  { %v160_v10 = vld [vmem:[#allocation3] sm:$0xf] }
 0x1d6   :  { %161 = vst.msk [vmem:[%s253_s1] sm:$0xf] %vm24_vm1, %v160_v10 }
 0x1d7   :  { %166 = vsyncpa [#allocation5], 1 }

</bundles_post_ra>
